<compile_context>
chip_gen: v7x
topology: tpu7x:2x2x1
jax: 0.10.0
libtpu: 0.0.40
codegen_flags: <defaults>
</compile_context>

<pallas_src>
import functools

import jax
import jax.numpy as jnp
from jax.experimental import pallas as pl
from jax.experimental.pallas import tpu as pltpu


def fused_kernel(cols_ref, w1_ref, b1_ref, wfc_ref, out_ref, *, bn, hw, inv_hw):
    # cols_ref: (9*Cin, bn*hw)  bf16 im2col slab; lane axis = flattened (image, pixel)
    # w1_ref  : (Cmid, 9*Cin)   bf16 conv1 weights (tap-major to match the slab)
    # b1_ref  : (Cmid, 1)       f32 conv1 bias
    # wfc_ref : (Cmid, CPAD)    f32 fc weights, class axis zero-padded to 128 lanes
    # out_ref : (bn, 1, CPAD)   f32 logits (lane-padded)

    # conv1 as ONE (Cmid, 27) x (27, bn*hw) MXU contraction, f32 accumulation.
    conv = jnp.dot(w1_ref[...], cols_ref[...],
                   preferred_element_type=jnp.float32)            # (Cmid, bn*hw)
    conv = jnp.maximum(conv + b1_ref[...], jnp.float32(0.0))      # bias + ReLU (VPU, f32)

    # adaptive_avg_pool2d((1,1)): per-image cross-lane reduce over the hw pixels.
    pooled = jnp.concatenate(
        [jnp.sum(conv[:, n * hw:(n + 1) * hw], axis=-1, keepdims=True)
         for n in range(bn)],
        axis=-1) * jnp.float32(inv_hw)                            # (Cmid, bn)

    # fc (1x1 conv, no bias) as Cmid broadcast FMAs on the VPU:
    #   logits[n, o] = sum_c pooled[c, n] * wfc[c, o]
    logits = jnp.sum(pooled[:, :, None] * wfc_ref[...][:, None, :], axis=0)  # (bn, CPAD)
    out_ref[...] = logits[:, None, :].astype(out_ref.dtype)       # (bn, 1, CPAD)


def test_model_forward(x_nchw, w1_oihw, b1, wfc_oihw, *, batch_block=None):
    """Fused TestModel forward. Inputs in PyTorch layouts; returns (N, Cout, 1, 1)."""
    N, Cin, H, W = x_nchw.shape
    Cmid = w1_oihw.shape[0]
    Cout = wfc_oihw.shape[0]
    HW = H * W
    KC = 9 * Cin
    CPAD = ((Cout + 127) // 128) * 128  # lane-pad the class axis -> unmasked stores

    if batch_block is None:
        # Amortize per-grid-step overhead, but keep >= 2 steps so both v7x TCs get work.
        batch_block = N // 2 if (N % 2 == 0 and N >= 4) else 1
    bn = batch_block
    assert N % bn == 0, (N, bn)

    # ---- XLA-side glue (fuses into one HBM pass): pad + im2col, lane-dense slab ----
    x = x_nchw.astype(jnp.float32)
    xp = jnp.pad(x, ((0, 0), (0, 0), (1, 1), (1, 1)))               # (N, Cin, H+2, W+2)
    taps = [xp[:, :, dh:dh + H, dw:dw + W]                          # 9 x (N, Cin, H, W)
            for dh in range(3) for dw in range(3)]
    cols = jnp.stack(taps, axis=0)                                  # (9, N, Cin, H, W)
    cols = cols.transpose(0, 2, 1, 3, 4).reshape(KC, N * HW)        # (9*Cin, N*HW)
    cols = cols.astype(jnp.bfloat16)                                # bf16 MXU operand

    # conv1 weight OIHW -> (Cmid, 9*Cin), k = (dh*3+dw)*Cin + cin (matches the slab).
    w1_mat = jnp.transpose(w1_oihw, (0, 2, 3, 1)).reshape(Cmid, KC).astype(jnp.bfloat16)
    b1_col = b1.reshape(Cmid, 1).astype(jnp.float32)
    # fc weight (Cout, Cmid, 1, 1) -> (Cmid, CPAD), zero-padded along the class/lane axis.
    wfc_pad = jnp.zeros((Cmid, CPAD), jnp.float32).at[:, :Cout].set(
        wfc_oihw.reshape(Cout, Cmid).T.astype(jnp.float32))

    kernel = functools.partial(fused_kernel, bn=bn, hw=HW, inv_hw=1.0 / HW)

    out = pl.pallas_call(
        kernel,
        out_shape=jax.ShapeDtypeStruct((N, 1, CPAD), jnp.float32),
        grid_spec=pltpu.PrefetchScalarGridSpec(
            num_scalar_prefetch=0,
            grid=(N // bn,),
            in_specs=[
                pl.BlockSpec((KC, bn * HW), lambda i: (0, i)),      # im2col slab (per batch block)
                pl.BlockSpec((Cmid, KC), lambda i: (0, 0)),         # conv1 weights (resident)
                pl.BlockSpec((Cmid, 1), lambda i: (0, 0)),          # conv1 bias
                pl.BlockSpec((Cmid, CPAD), lambda i: (0, 0)),       # fc weights (lane-padded)
            ],
            out_specs=pl.BlockSpec((bn, 1, CPAD), lambda i: (i, 0, 0)),
        ),
        compiler_params=pltpu.CompilerParams(
            dimension_semantics=("parallel",)),
    )(cols, w1_mat, b1_col, wfc_pad)

    # (N, 1, CPAD) -> PyTorch NCHW (N, Cout, 1, 1).
    return out.reshape(N, CPAD)[:, :Cout].reshape(N, Cout, 1, 1)


def _reference(x, w1, b1, wfc):
    """Pure-JAX float reference of the module's forward."""
    y = jax.lax.conv_general_dilated(
        x, w1, (1, 1), ((1, 1), (1, 1)),
        dimension_numbers=('NCHW', 'OIHW', 'NCHW'))
    y = jnp.maximum(y + b1[None, :, None, None], 0.0)
    y = jnp.mean(y, axis=(2, 3), keepdims=True)
    y = jax.lax.conv_general_dilated(
        y, wfc, (1, 1), 'VALID',
        dimension_numbers=('NCHW', 'OIHW', 'NCHW'))
    return y


if __name__ == "__main__":
    key = jax.random.PRNGKey(0)
    k_x, k_w1, k_b1, k_fc = jax.random.split(key, 4)

    # Shapes fixed by the module: conv1 is 3->16 (3x3), fc is 16->10 (1x1).
    N, Cin, H, W = 2, 3, 16, 16
    Cmid, Cout = 16, 10

    x = jax.random.normal(k_x, (N, Cin, H, W), dtype=jnp.float32)
    w1 = jax.random.normal(k_w1, (Cmid, Cin, 3, 3), dtype=jnp.float32) * 0.1   # OIHW
    b1 = jax.random.normal(k_b1, (Cmid,), dtype=jnp.float32) * 0.1
    wfc = jax.random.normal(k_fc, (Cout, Cmid, 1, 1), dtype=jnp.float32) * 0.1  # OIHW

    y = test_model_forward(x, w1, b1, wfc)
    y = jax.block_until_ready(y)
    assert y.shape == (N, Cout, 1, 1), y.shape

    # Sanity check vs. float reference (loose tolerance for bf16 MXU operands).
    y_ref = jax.block_until_ready(_reference(x, w1, b1, wfc))
    max_err = float(jnp.max(jnp.abs(y - y_ref)))
    assert max_err < 3e-2, max_err

    print("KERNEL_OK")
</pallas_src>

<mosaic_0001>
module attributes {stable_mosaic.version = 11 : i64} {
  func.func @fused_kernel(%arg0: i32, %arg1: memref<27x256xbf16, #tpu.memory_space<vmem>>, %arg2: memref<16x27xbf16, #tpu.memory_space<vmem>>, %arg3: memref<16x1xf32, #tpu.memory_space<vmem>>, %arg4: memref<16x128xf32, #tpu.memory_space<vmem>>, %arg5: memref<1x1x128xf32, #tpu.memory_space<vmem>>) attributes {dimension_semantics = [#tpu.dimension_semantics<parallel>], iteration_bounds = array<i64: 2>, scalar_prefetch = 0 : i64, scratch_operands = 0 : i64, tpu.core_type = #tpu.core_type<tc>, window_params = [{transform_indices = @transform_0, window_bounds = array<i64: 27, 256>}, {pipeline_mode = #tpu.pipeline_mode<synchronous>, transform_indices = @transform_1, window_bounds = array<i64: 16, 27>}, {pipeline_mode = #tpu.pipeline_mode<synchronous>, transform_indices = @transform_2, window_bounds = array<i64: 16, 1>}, {pipeline_mode = #tpu.pipeline_mode<synchronous>, transform_indices = @transform_3, window_bounds = array<i64: 16, 128>}, {transform_indices = @transform_4, window_bounds = array<i64: 1, 1, 128>}]} {
    %c0 = arith.constant 0 : index
    %c0_0 = arith.constant 0 : index
    %0 = vector.load %arg2[%c0, %c0_0] : memref<16x27xbf16, #tpu.memory_space<vmem>>, vector<16x27xbf16>
    %c0_1 = arith.constant 0 : index
    %c0_2 = arith.constant 0 : index
    %1 = vector.load %arg1[%c0_1, %c0_2] : memref<27x256xbf16, #tpu.memory_space<vmem>>, vector<27x256xbf16>
    %cst = arith.constant dense<0.000000e+00> : vector<16x256xf32>
    %2 = tpu.matmul %0, %1, %cst {dimension_numbers = #tpu.dot_dimension_numbers<[1], [0], [0], [1], [0, 0, 1, 1], [], []>} : vector<16x27xbf16>, vector<27x256xbf16>, vector<16x256xf32> -> vector<16x256xf32>
    %c0_3 = arith.constant 0 : index
    %c0_4 = arith.constant 0 : index
    %3 = vector.load %arg3[%c0_3, %c0_4] : memref<16x1xf32, #tpu.memory_space<vmem>>, vector<16x1xf32>
    %4 = vector.broadcast %3 : vector<16x1xf32> to vector<16x256xf32>
    %5 = arith.addf %2, %4 : vector<16x256xf32>
    %cst_5 = arith.constant 0.000000e+00 : f32
    %6 = vector.broadcast %cst_5 : f32 to vector<16x256xf32>
    %7 = arith.maximumf %5, %6 : vector<16x256xf32>
    %cst_6 = arith.constant dense<0.000000e+00> : vector<16xf32>
    %8 = vector.multi_reduction <add>, %7, %cst_6 [1] : vector<16x256xf32> to vector<16xf32>
    %9 = vector.shape_cast %8 : vector<16xf32> to vector<16x1xf32>
    %cst_7 = arith.constant 3.906250e-03 : f32
    %10 = vector.broadcast %cst_7 : f32 to vector<16x1xf32>
    %11 = arith.mulf %9, %10 : vector<16x1xf32>
    %12 = vector.shape_cast %11 : vector<16x1xf32> to vector<16x1x1xf32>
    %c0_8 = arith.constant 0 : index
    %c0_9 = arith.constant 0 : index
    %13 = vector.load %arg4[%c0_8, %c0_9] : memref<16x128xf32, #tpu.memory_space<vmem>>, vector<16x128xf32>
    %14 = vector.shape_cast %13 : vector<16x128xf32> to vector<16x1x128xf32>
    %15 = vector.broadcast %12 : vector<16x1x1xf32> to vector<16x1x128xf32>
    %16 = arith.mulf %15, %14 : vector<16x1x128xf32>
    %cst_10 = arith.constant dense<0.000000e+00> : vector<1x128xf32>
    %17 = vector.multi_reduction <add>, %16, %cst_10 [0] : vector<16x1x128xf32> to vector<1x128xf32>
    %18 = vector.shape_cast %17 : vector<1x128xf32> to vector<1x1x128xf32>
    %c0_11 = arith.constant 0 : index
    %c0_12 = arith.constant 0 : index
    %c0_13 = arith.constant 0 : index
    %19 = vector.load %arg5[%c0_11, %c0_12, %c0_13] : memref<1x1x128xf32, #tpu.memory_space<vmem>>, vector<1x1x128xf32>
    tpu.vector_store %arg5[%c0_11, %c0_12, %c0_13], %18 {strides = array<i32>} : memref<1x1x128xf32, #tpu.memory_space<vmem>>, vector<1x1x128xf32>,
    return
  }
  func.func @transform_0(%arg0: i32) -> (i32, i32) {
    %c0_i32 = arith.constant 0 : i32
    %c0_i32_0 = arith.constant 0 : i32
    return %c0_i32, %arg0 : i32, i32
  }
  func.func @transform_1(%arg0: i32) -> (i32, i32) {
    %c0_i32 = arith.constant 0 : i32
    %c0_i32_0 = arith.constant 0 : i32
    %c0_i32_1 = arith.constant 0 : i32
    return %c0_i32, %c0_i32_0 : i32, i32
  }
  func.func @transform_2(%arg0: i32) -> (i32, i32) {
    %c0_i32 = arith.constant 0 : i32
    %c0_i32_0 = arith.constant 0 : i32
    %c0_i32_1 = arith.constant 0 : i32
    return %c0_i32, %c0_i32_0 : i32, i32
  }
  func.func @transform_3(%arg0: i32) -> (i32, i32) {
    %c0_i32 = arith.constant 0 : i32
    %c0_i32_0 = arith.constant 0 : i32
    %c0_i32_1 = arith.constant 0 : i32
    return %c0_i32, %c0_i32_0 : i32, i32
  }
  func.func @transform_4(%arg0: i32) -> (i32, i32, i32) {
    %c0_i32 = arith.constant 0 : i32
    %c0_i32_0 = arith.constant 0 : i32
    %c0_i32_1 = arith.constant 0 : i32
    return %arg0, %c0_i32, %c0_i32_0 : i32, i32, i32
  }
}

</mosaic_0001>

<bundles_post_ra>
// kernel: tpu_custom_call.1
= control target key start
LH: loop header
LB: loop body
LE: loop exit
PB: predicated region body
PF: predicated region fallthrough
CT: control target
= control target key end

     0   :  { %9 = vsyncpa [#allocation3], 0  ;;  %s1085_s0 = inlined_call_operand.hbm [shape: bf16[27,512], index: 0, kind: input, shape index: {}]   ;;  %s1086_s1 = inlined_call_operand.vmem [shape: bf16[16,27], index: 1, kind: input, shape index: {}]   ;;  %s1087_s2 = inlined_call_operand.vmem [shape: f32[16,1], index: 2, kind: input, shape index: {}]   ;;  %s1088_s3 = inlined_call_operand.vmem [shape: f32[16,128], index: 3, kind: input, shape index: {}]   ;;  %s1089_s4 = inlined_call_operand.hbm [shape: f32[2,1,128], index: 4, kind: output, shape index: {}]  }
   0x1   :  { %11 = vsyncpa [#allocation3 + $0x1], 0 }
   0x2   :  { %12 = vsyncpa [#allocation4], 0 }
   0x3   :  { %14 = vsyncpa [#allocation4 + $0x1], 0  ;;  %s866_s15 = smov 0   ;;  %s868_s16 = smov 0  }
   0x4   :  { %s870_s17 = smov 0   ;;  %s872_s18 = smov 0  }
   0x5 LB: > { %s887_s19 = sadd.s32 4294967295, %s831_s18   ;;  %s655_s20 = sadd.s32 4294967294, %s831_s18   ;;  %s831_s18 = sphi %s872_s18, %s1103_s18   ;;  %s827_s17 = sphi %s870_s17, %s1102_s17   ;;  %s823_s16 = sphi %s868_s16, %s1101_s16   ;;  %s819_s15 = sphi %s866_s15, %s1100_s15  }
   0x6   : > { %s891_s21 = sadd.s32 1, %s831_s18   ;;  %s27_s22 = sadd.s32 1, %s827_s17 }
   0x7   : > { %s24_s23 = ssub.s32 %s831_s18, %s891_s21  ;;  %p34_p0 = scmp.ne.s32.totalorder %s827_s17, %s823_s16 }
   0x8   : > { %p25_p1 = scmp.eq.s32.totalorder %s24_s23, 0  ;;  %p35_p2 = scmp.eq.s32.totalorder %s831_s18, 0 }
   0x9   : > { %p40_p3 = scmp.ne.s32.totalorder %s823_s16, %s819_s15  ;;  %p41_p4 = scmp.eq.s32.totalorder %s887_s19, 0 }
   0xa   : > { %s903_s24 = scalar_select %p25_p1, %s827_s17, %s27_s22  }
   0xb   : > { %p905_p5 = por %p35_p2, %p34_p0  ;;  %p909_p6 = por %p41_p4, %p40_p3 }
   0xc   : > { %p127_p7 = scmp.eq.s32.totalorder %s887_s19, 1  ;;  %p133_p8 = scmp.eq.s32.totalorder %s655_s20, 1 }
   0xd   : > { %p685_p10 = scmp.lt.s32.totalorder %s831_s18, 2  ;;  %s162_s29 = sand.u32 1, %s827_s17  }
   0xe   : > { %p916_p11 = por %p127_p7, %p34_p0  ;;  %p920_p12 = por %p133_p8, %p40_p3 }
   0xf   : > { %s672_s30 = sshll.u32 %s831_s18, 7  ;;  %s658_s5 = sshll.u32 %s162_s29, 5 }
  0x10   : > { %s1093_s27 = scalar_select %p916_p11, 1, 0 }
  0x11   : > { %s1094_s28 = scalar_select %p920_p12, 1, 0 }
  0x12   : > { %s929_s8 = scalar_lea.hbm %s1085_s0, %s672_s30  ;;  %s166_s9 = scalar_lea.vmem [#allocation2], %s658_s5 }
  0x13   : > { %s173_s10 = sshll.u32 %s166_s9, 4  ;;  %p933_p13 = pnand %p685_p10, %p905_p5  ;;  %s937_s10 = int_to_ptr.vmem [resolvable:$true] %s173_s10 }
  0x14   : > { %s940_s12 = scalar_lea.sflag [#allocation3], %s162_s29  ;;  %s735_s13 = scalar_lea.hbm %s929_s8, 512 }
  0x15   : > { %p736_p1 = scmp.ne.s32.totalorder %s929_s8, %s735_s13  ;;  %p737_p2 = pneg %p933_p13 }
  0x16   : > { %s740_s22 = scalar_lea.hbm %s1085_s0, 1024  ;;  %p741_p5 = scmp.lt.u32.totalorder %s929_s8, %s1085_s0 }
  0x17   : > { %p738_p3 = pnand %p737_p2, %p736_p1  ;;  %p742_p7 = scmp.lt.u32.totalorder %s740_s22, %s735_s13 }
  0x18   : > { %p744_p10 = scmp.lt.u32.totalorder %s735_s13, %s929_s8 }
  0x19   : > { %p739_p4 = pneg %p738_p3  ;;  %p743_p8 = por %p742_p7, %p741_p5 }
  0x1b   : > { %p745_p9 = por %p744_p10, %p743_p8 }
  0x1d   : > { %p746_p0 = pnand %p745_p9, %p739_p4 }
  0x1f   : > { %749 = shalt.err (!%p746_p0)
}
  0x20   : > { %s750_s29 = scalar_lea.vmem %s937_s10, 512  ;;  %s833_s30 = smov [#allocation2]  }
  0x21   : > { %p751_p1 = scmp.ne.s32.totalorder %s937_s10, %s750_s29  ;;  %s755_s5 = sshll.u32 %s833_s30, 4  ;;  %s756_s5 = int_to_ptr.vmem [resolvable:$false] %s755_s5 }
  0x22   : > { %s757_s6 = scalar_lea.vmem %s756_s5, 1024  ;;  %p758_p11 = scmp.lt.s32.totalorder %s937_s10, %s756_s5 }
  0x23   : > { %p753_p3 = pnand %p751_p1, %p737_p2  ;;  %p759_p5 = scmp.lt.s32.totalorder %s757_s6, %s750_s29 }
  0x25   : > { %p754_p12 = pneg %p753_p3  ;;  %p760_p7 = por %p759_p5, %p758_p11 }
  0x27   : > { %p761_p8 = pnand %p760_p7, %p754_p12 }
  0x29   : > { %764 = shalt.err (!%p761_p8)
}
  0x2a   : > { %s834_s7 = smov 256   ;;  %s835_s9 = smov 128  }
  0x2b   : > { %s836_s13 = smov 8   ;;  %p181_p9 = scmp.lt.s32.totalorder %s831_s18, 3 }
  0x2c   : > { %680 = dma.hbm_to_vmem [thread:$0]  (!%p933_p13), %s929_s8, 512, %s937_s10, %s940_s12, %s834_s7, %s835_s9, %s836_s13  }
  0x2d   : > { %p1096_p0 = scmp.ge.s32.totalorder %s831_s18, 1 }
  0x2f   : > { %p182_p2 = pnand %p1096_p0, %p181_p9 }
  0x30   : > { %s972_s14 = sand.u32 (!%p182_p2), 1, %s823_s16  }
  0x31   : > { %185 = sbr.rel (%p182_p2) target bundleno = 479 (0x1df), region = 36  ;;  %s662_s20 = sshll.u32 (!%p182_p2), %s972_s14, 5 }
  0x32   : > { %s188_s22 = scalar_lea.sflag (!%p182_p2), [#allocation3], %s972_s14  ;;  %s191_s23 = scalar_lea.vmem (!%p182_p2), [#allocation2], %s662_s20 }
  0x38   : > { %810 = dma.done.wait (%p909_p6), %s188_s22, 512  }
  0x39   : > { %812 = vsyncadd (%p909_p6), %s188_s22, 4294966784  ;;  %v837_v0 = vmov 0   ;;  %vm262_vm0 = vcmask 1044480   ;;  %vm263_vm1 = vcmask 1045504   ;;  %v838_v1 = vmov 65535   ;;  %v223_v10 = vld [vmem:[%s1087_s2] sm:$0xff] }
  0x3a   : > { %304 = vmatprep.mubr.bf16.mxu0 %v837_v0  ;;  %725 = vset.pattern.permute.xlu0 %v837_v0  ;;  %v264_v2 = vsel %vm262_vm0, 4294967295, %v838_v1  ;;  %v726_v3 = vld [vmem:[%s191_s23 + $0x4] ss:$8 sps:$4 sm:$0xff]   ;;  %v728_v4 = vld [vmem:[%s191_s23] ss:$8 sps:$4 sm:$0xff]   ;;  %vm258_vm2 = vcmask 220160   ;;  %v329_v29 = vlaneseq }
  0x3b   : > { %v265_v5 = vsel %vm263_vm1, %v264_v2, 0  ;;  %272 = vmatprep.subr.bf16.mxu0 %v726_v3  ;;  %v729_v6 = vld [vmem:[%s191_s23 + $0x14] ss:$8 sps:$4 sm:$0x3f]   ;;  %227 = vperm.xlu0 %725, %v223_v10   ;;  %v732_v11 = vld [vmem:[%s1086_s1] sm:$0xff]   ;;  %v224_v12 = vld [vmem:[%s1087_s2 + $0x8] sm:$0xff] }
  0x3c   : > { %v731_v7 = vld [vmem:[%s191_s23 + $0x10] ss:$8 sps:$4 sm:$0x3f]   ;;  %273 = vmatpush1.bf16.msra.mxu0 %v728_v4  ;;  %v270_v8 = vand.u32 %v729_v6, %v265_v5  ;;  %v839_v30 = vmov 1966171168   ;;  %v989_v32 = vshrl.u32 %v329_v29, 7 }
  0x3d   : > { %v267_v9 = vand.u32 %v731_v7, %v265_v5  ;;  %v415_v31 = vunpack.c.l.s4 %v839_v30  ;;  %v409_v35 = vld [vmem:[%s1088_s3] sm:$0xff]  ;;  %vm543_vm3 = vcmask 1040384   ;;  %v410_v62 = vld [vmem:[%s1088_s3 + $0x8] sm:$0xff]  ;;  %s669_s7 = sshll.u32 %s887_s19, 4  ;;  %s214_s9 = scalar_lea.vmem [#allocation5], %s972_s14 }
  0x3e   : > { %274 = vmatprep.subr.bf16.mxu0 %v270_v8  ;;  %v413_v37 = vcombine.high %v409_v35, %v409_v35  ;;  %v331_v38 = vsub.s32 0, %v989_v32  ;;  %v335_v39 = vsub.s32 1, %v989_v32  ;;  %v339_v43 = vsub.s32 2, %v989_v32  ;;  %s589_s13 = sshll.u32 %s214_s9, 4  ;;  %s1041_s23 = scalar_lea.hbm %s1089_s4, %s669_s7  ;;  %s1043_s13 = int_to_ptr.vmem [resolvable:$true] %s589_s13 }
  0x3f   : > { %232 = vperm.xlu0 %725, %v224_v12   ;;  %v416_v33 = vunpack.c.0.s8 %v415_v31  ;;  %v343_v48 = vsub.s32 3, %v989_v32  ;;  %v347_v51 = vsub.s32 4, %v989_v32  ;;  %v351_v53 = vsub.s32 5, %v989_v32  ;;  %s577_s8 = scalar_lea.sflag [#allocation4], %s972_s14  ;;  %s765_s10 = scalar_lea.vmem %s1043_s13, 16 }
  0x40   : > { %275 = vmatpush1.bf16.msra.mxu0 %v267_v9  ;;  %v355_v61 = vsub.s32 6, %v989_v32  ;;  %v359_v1 = vsub.s32 7, %v989_v32  ;;  %p766_p6 = scmp.ne.s32.totalorder %s1043_s13, %s765_s10  ;;  %p1097_p11 = scmp.ne.s32.totalorder %s1093_s27, 0 }
  0x41   : > { %v992_v34 = vsub.s32 %v416_v33, %v989_v32  ;;  %s840_s19 = smov [#allocation5]  }
  0x42   : > { %p767_p12 = pnand %p766_p6, %p1097_p11  ;;  %s769_s26 = sshll.u32 %s840_s19, 4  ;;  %s770_s26 = int_to_ptr.vmem [resolvable:$false] %s769_s26 }
  0x43   : > { %668 = vmatmul.mubr.msk.bf16.vlgmr.msra.gmra.mrb[0].mxu0 %vm258_vm2, %v732_v11  ;;  %v420_v36 = vrot.slane %v409_v35, %v992_v34  ;;  %v427_v45 = vrot.slane %v413_v37, %v992_v34  ;;  %v469_v3 = vrot.slane %v410_v62, %v992_v34  ;;  %s771_s11 = scalar_lea.vmem %s770_s26, 32  ;;  %p772_p4 = scmp.lt.s32.totalorder %s1043_s13, %s770_s26 }
  0x44   : > { %p768_p13 = pneg %p767_p12  ;;  %p773_p10 = scmp.lt.s32.totalorder %s771_s11, %s765_s10 }
  0x45   : > { %v428_v40 = vcombine.high %v420_v36, %v420_v36  ;;  %v436_v44 = vrot.slane %v420_v36, %v992_v34  ;;  %v429_v54 = vcombine.high %v427_v45, %v427_v45  ;;  %v443_v59 = vrot.slane %v427_v45, %v992_v34 }
  0x46   : > { %p774_p1 = por %p773_p10, %p772_p4 }
  0x47   : > { %v450_v49 = vrot.slane %v428_v40, %v992_v34  ;;  %v458_v52 = vcombine.high %v436_v44, %v436_v44  ;;  %v457_v2 = vrot.slane %v429_v54, %v992_v34  ;;  %v459_v8 = vcombine.high %v443_v59, %v443_v59 }
  0x48   : > { %p775_p3 = pnand %p774_p1, %p768_p13 }
  0x49   : > { %v460_v56 = vcombine.high %v450_v49, %v450_v49 }
  0xba   : > { %v228_v13 = vpop.permute.xlu0 %227 }
  0xbe   : > { %v233_v15 = vpop.permute.xlu0 %232 }
 0x116   : > { %v306_v14 = vpop.f32.mrb[0].mxu0 }
 0x117   : > { %v307_v16 = vadd.f32 %v306_v14, %v228_v13  ;;  %v308_v17 = vpop.f32.mrb[1].mxu0  ;;  %v461_v14 = vcombine.high %v457_v2, %v457_v2 }
 0x118   : > { %v309_v18 = vadd.f32 %v308_v17, %v228_v13  ;;  %v310_v19 = vpop.f32.mrb[2].mxu0 }
 0x119   : > { %v315_v20 = vmax.f32 %v307_v16, 0.0  ;;  %v311_v21 = vadd.f32 %v310_v19, %v233_v15  ;;  %v312_v22 = vpop.f32.mrb[3].mxu0 }
 0x11a   : > { %v316_v23 = vmax.f32 %v309_v18, 0.0  ;;  %v313_v24 = vadd.f32 %v312_v22, %v233_v15  ;;  %v462_v15 = vcombine.high %v410_v62, %v410_v62  ;;  %v477_v18 = vcombine.high %v469_v3, %v469_v3 }
 0x11b   : > { %v317_v25 = vmax.f32 %v311_v21, 0.0 }
 0x11c   : > { %v318_v26 = vmax.f32 %v313_v24, 0.0  ;;  %v319_v27 = vadd.f32 %v316_v23, %v315_v20  ;;  %v485_v23 = vrot.slane %v469_v3, %v992_v34  ;;  %v499_v29 = vrot.slane %v477_v18, %v992_v34 }
 0x11e   : > { %320 = vadd.xlane.f32.xlu1 %v319_v27  ;;  %v322_v28 = vadd.f32 %v318_v26, %v317_v25  ;;  %v476_v26 = vrot.slane %v462_v15, %v992_v34  ;;  %v507_v35 = vcombine.high %v485_v23, %v485_v23 }
 0x122   : > { %323 = vadd.xlane.f32.xlu1 %v322_v28 }
 0x1ab   : > { %v321_v41 = vpop.xlane.xlu1 %320 }
 0x1ac   : > { %v325_v42 = vmul.f32 0.00390625, %v321_v41 }
 0x1ae   : > { %v332_v46 = vrot.slane %v325_v42, %v331_v38  ;;  %v336_v47 = vrot.slane %v325_v42, %v335_v39  ;;  %v340_v50 = vrot.slane %v325_v42, %v339_v43  ;;  %v344_v55 = vrot.slane %v325_v42, %v343_v48 }
 0x1af   : > { %v348_v60 = vrot.slane %v325_v42, %v347_v51  ;;  %v324_v0 = vpop.xlane.xlu1 %323  ;;  %v352_v4 = vrot.slane %v325_v42, %v351_v53  ;;  %v356_v11 = vrot.slane %v325_v42, %v355_v61  ;;  %v360_v17 = vrot.slane %v325_v42, %v359_v1 }
 0x1b0   : > { %v527_v57 = vmul.f32 %v436_v44, %v332_v46  ;;  %v528_v58 = vmul.f32 %v450_v49, %v336_v47  ;;  %v529_v63 = vmul.f32 %v458_v52, %v340_v50  ;;  %v530_v5 = vmul.f32 %v460_v56, %v344_v55 }
 0x1b1   : > { %v326_v10 = vmul.f32 0.00390625, %v324_v0  ;;  %v531_v12 = vmul.f32 %v443_v59, %v348_v60  ;;  %v532_v19 = vmul.f32 %v457_v2, %v352_v4  ;;  %v533_v24 = vmul.f32 %v459_v8, %v356_v11 }
 0x1b2   : > { %v544_v6 = vsel %vm543_vm3, %v527_v57, 0.0  ;;  %v545_v7 = vsel %vm543_vm3, %v528_v58, 0.0  ;;  %v547_v13 = vsel %vm543_vm3, %v529_v63, 0.0  ;;  %v549_v20 = vsel %vm543_vm3, %v530_v5, 0.0 }
 0x1b3   : > { %v546_v9 = vadd.f32 %v545_v7, %v544_v6  ;;  %v364_v22 = vrot.slane %v326_v10, %v331_v38  ;;  %v551_v25 = vsel %vm543_vm3, %v531_v12, 0.0  ;;  %v368_v28 = vrot.slane %v326_v10, %v335_v39 }
 0x1b4   : > { %v534_v30 = vmul.f32 %v461_v14, %v360_v17  ;;  %v553_v31 = vsel %vm543_vm3, %v532_v19, 0.0  ;;  %v372_v33 = vrot.slane %v326_v10, %v339_v43  ;;  %v555_v37 = vsel %vm543_vm3, %v533_v24, 0.0 }
 0x1b5   : > { %v548_v16 = vadd.f32 %v547_v13, %v546_v9  ;;  %v535_v36 = vmul.f32 %v485_v23, %v364_v22  ;;  %v478_v38 = vcombine.high %v476_v26, %v476_v26  ;;  %v376_v41 = vrot.slane %v326_v10, %v343_v48 }
 0x1b6   : > { %v509_v42 = vcombine.high %v499_v29, %v499_v29  ;;  %v536_v44 = vmul.f32 %v499_v29, %v368_v28  ;;  %v557_v45 = vsel %vm543_vm3, %v534_v30, 0.0  ;;  %v380_v39 = vrot.slane %v326_v10, %v347_v51 }
 0x1b7   : > { %v550_v21 = vadd.f32 %v549_v20, %v548_v16  ;;  %v492_v47 = vrot.slane %v476_v26, %v992_v34  ;;  %v537_v49 = vmul.f32 %v507_v35, %v372_v33  ;;  %v559_v50 = vsel %vm543_vm3, %v535_v36, 0.0 }
 0x1b8   : > { %v384_v43 = vrot.slane %v326_v10, %v351_v53  ;;  %v506_v54 = vrot.slane %v478_v38, %v992_v34  ;;  %v538_v55 = vmul.f32 %v509_v42, %v376_v41  ;;  %v561_v56 = vsel %vm543_vm3, %v536_v44, 0.0 }
 0x1b9   : > { %v552_v27 = vadd.f32 %v551_v25, %v550_v21  ;;  %v388_v48 = vrot.slane %v326_v10, %v355_v61  ;;  %v508_v58 = vcombine.high %v492_v47, %v492_v47  ;;  %v539_v59 = vmul.f32 %v492_v47, %v380_v39 }
 0x1ba   : > { %v563_v51 = vsel %vm543_vm3, %v537_v49, 0.0  ;;  %v392_v62 = vrot.slane %v326_v10, %v359_v1  ;;  %v510_v63 = vcombine.high %v506_v54, %v506_v54  ;;  %v540_v0 = vmul.f32 %v506_v54, %v384_v43 }
 0x1bb   : > { %v554_v32 = vadd.f32 %v553_v31, %v552_v27  ;;  %v565_v2 = vsel %vm543_vm3, %v538_v55, 0.0  ;;  %v541_v3 = vmul.f32 %v508_v58, %v388_v48  ;;  %v567_v34 = vsel %vm543_vm3, %v539_v59, 0.0 }
 0x1bc   : > { %v542_v5 = vmul.f32 %v510_v63, %v392_v62  ;;  %v569_v61 = vsel %vm543_vm3, %v540_v0, 0.0 }
 0x1bd   : > { %v556_v40 = vadd.f32 %v555_v37, %v554_v32  ;;  %v571_v7 = vsel %vm543_vm3, %v541_v3, 0.0 }
 0x1be   : > { %v573_v8 = vsel %vm543_vm3, %v542_v5, 0.0 }
 0x1bf   : > { %v558_v46 = vadd.f32 %v557_v45, %v556_v40 }
 0x1c1   : > { %v560_v52 = vadd.f32 %v559_v50, %v558_v46 }
 0x1c3   : > { %v562_v57 = vadd.f32 %v561_v56, %v560_v52 }
 0x1c5   : > { %v564_v60 = vadd.f32 %v563_v51, %v562_v57 }
 0x1c7   : > { %v566_v53 = vadd.f32 %v565_v2, %v564_v60 }
 0x1c9   : > { %v568_v4 = vadd.f32 %v567_v34, %v566_v53 }
 0x1cb   : > { %v570_v6 = vadd.f32 %v569_v61, %v568_v4 }
 0x1cd   : > { %v572_v1 = vadd.f32 %v571_v7, %v570_v6 }
 0x1cf   : > { %v574_v9 = vadd.f32 %v573_v8, %v572_v1 }
 0x1d1   : > { %575 = vst [vmem:[%s214_s9] sm:$0x1] %v574_v9 }
 0x1d2   : > { %778 = shalt.err (!%p775_p3)
}
 0x1d3   : > { %s779_s14 = scalar_lea.hbm %s1041_s23, 16  ;;  %s783_s29 = scalar_lea.hbm %s1089_s4, 32 }
 0x1d4   : > { %p780_p5 = scmp.ne.s32.totalorder %s1041_s23, %s779_s14  ;;  %p784_p9 = scmp.lt.u32.totalorder %s1041_s23, %s1089_s4 }
 0x1d5   : > { %p785_p0 = scmp.lt.u32.totalorder %s783_s29, %s779_s14  ;;  %p787_p6 = scmp.lt.u32.totalorder %s779_s14, %s1041_s23 }
 0x1d6   : > { %p781_p7 = pnand %p780_p5, %p1097_p11 }
 0x1d7   : > { %p786_p2 = por %p785_p0, %p784_p9 }
 0x1d8   : > { %p782_p8 = pneg %p781_p7 }
 0x1d9   : > { %p788_p12 = por %p787_p6, %p786_p2 }
 0x1db   : > { %p789_p13 = pnand %p788_p12, %p782_p8 }
 0x1dd   : > { %792 = shalt.err (!%p789_p13)
}
 0x1de   : > { %675 = dma.vmem_to_hbm [thread:$0]  (%p1097_p11), %s1043_s13, 16, %s1041_s23, %s577_s8  }
 0x1df PF: > { %s601_s6 = sand.u32 1, %s819_s15   ;;  %p1098_p4 = scmp.ne.s32.totalorder %s1094_s28, 0 }
 0x1e0   : > { %p1099_p10 = scmp.ge.s32.totalorder %s831_s18, 2  ;;  %s602_s7 = scalar_lea.sflag [#allocation4], %s601_s6 }
 0x1e2   : > { %p682_p1 = pnand %p1099_p10, %p1098_p4 }
 0x1e4   : > { %814 = dma.done.wait (!%p682_p1), %s602_s7, 16  }
 0x1e5   : > { %816 = vsyncadd (!%p682_p1), %s602_s7, 4294967280  ;;  %p17_p3 = scmp.ge.s32.totalorder %s891_s21, 4   ;;  %s1100_s15 = smov %s823_s16 }
 0x1e6   : > { %s1101_s16 = smov %s827_s17  ;;  %s1102_s17 = smov %s903_s24 }
 0x1e7   : > { %s1103_s18 = smov %s891_s21  ;;  %19 = sbr.rel (!%p17_p3) target bundleno = 5 (0x5), region = 81 }
 0x1ee   :  { %606 = vsyncpa [#allocation3], 1 }
 0x1ef   :  { %608 = vsyncpa [#allocation3 + $0x1], 1 }
 0x1f0   :  { %609 = vsyncpa [#allocation4], 1 }
 0x1f1   :  { %611 = vsyncpa [#allocation4 + $0x1], 1 }

</bundles_post_ra>
